<compile_context>
chip_gen: v5e
topology: v5e:2x2
jax: 0.10.0
libtpu: 0.0.40
codegen_flags: <defaults>
</compile_context>

<pallas_src>
import jax
import jax.numpy as jnp
from jax.experimental import pallas as pl
from jax.experimental.pallas import tpu as pltpu


LANE = 128                               # TPU lane width (last vreg dim)
_VMEM_SOFT_CAP = 48 * 1024 * 1024        # stay well under v7x's 64 MiB physical VMEM
_VMEM_TILE_BUDGET = 36 * 1024 * 1024     # budget used when sizing the batch tile


def _round_up(x, m):
    return ((x + m - 1) // m) * m


def _nbytes(x):
    return x.size * x.dtype.itemsize


def dueling_q_kernel(state_ref,
                     w1_ref, b1_ref,
                     wh1_ref, bh1_ref,
                     w2_ref, b2_ref,
                     q_ref):
    """Three MXU pushes: feature layer, fused V/A hidden layer, fused dueling combine."""
    # feature_layer: Linear + ReLU                       [tb, H]   (f32 accumulator)
    feat = jnp.maximum(
        jnp.dot(state_ref[...], w1_ref[...], preferred_element_type=jnp.float32)
        + b1_ref[...], 0.0)

    # fused value/advantage first layer: Linear + ReLU   [tb, 2H]  (h = [hv | ha])
    h = jnp.maximum(
        jnp.dot(feat.astype(wh1_ref.dtype), wh1_ref[...],
                preferred_element_type=jnp.float32)
        + bh1_ref[...], 0.0)

    # fused second layer + dueling combine:              [tb, Apad]
    #   Q = V + A - mean(A)  ==  h @ W2 + b2   (W2/b2 pre-folded + lane-padded)
    q_ref[...] = (jnp.dot(h.astype(w2_ref.dtype), w2_ref[...],
                          preferred_element_type=jnp.float32)
                  + b2_ref[...]).astype(q_ref.dtype)


def fuse_params(params, compute_dtype=jnp.bfloat16):
    """Fold the 10 nn.Linear tensors into 6 fused operands (exact algebra) in bf16."""
    (w1, b1, wv1, bv1, wv2, bv2, wa1, ba1, wa2, ba2) = params
    action_size = wa2.shape[1]
    action_pad = _round_up(max(action_size, LANE), LANE)

    # heads' first layer: shared LHS -> one matmul
    wh1 = jnp.concatenate([wv1, wa1], axis=1)                    # [H, 2H]
    bh1 = jnp.concatenate([bv1, ba1], axis=1)                    # [1, 2H]

    # heads' second layer + dueling combine -> one matmul
    wa2_centered = wa2 - jnp.mean(wa2, axis=1, keepdims=True)    # [H, A]
    w2 = jnp.concatenate([jnp.tile(wv2, (1, action_size)),       # V broadcast
                          wa2_centered], axis=0)                 # [2H, A]
    b2 = bv2 + ba2 - jnp.mean(ba2, axis=1, keepdims=True)        # [1, A]

    # Lane-dense output: zero-pad Q columns to a multiple of 128 so the store path
    # is full-width unmasked vst; the wrapper slices [:, :action_size].
    w2 = jnp.pad(w2, ((0, 0), (0, action_pad - action_size)))    # [2H, Apad]
    b2 = jnp.pad(b2, ((0, 0), (0, action_pad - action_size)))    # [1, Apad]

    # Weights in bf16 (half the DMA bytes / VMEM residency, 2x MXU rate);
    # biases stay f32 since they are added to the f32 accumulator.
    return (w1.astype(compute_dtype), b1.astype(jnp.float32),
            wh1.astype(compute_dtype), bh1.astype(jnp.float32),
            w2.astype(compute_dtype), b2.astype(jnp.float32))


def _pick_batch_tile(batch, state_size, action_pad, resident_bytes):
    """Largest multiple-of-8 batch tile that fits the VMEM budget, with >=2 programs
    when batch >= 16 so the 'parallel' axis can shard across both v7x TensorCores."""
    if batch <= 8:
        return batch
    # Per-row bytes of the pipelined (double-buffered) slabs: bf16 state in + f32 Q out.
    per_row = 2 * (state_size * 2 + action_pad * 4)
    avail = max(_VMEM_TILE_BUDGET - resident_bytes, 256 * 1024)
    tb = min(avail // per_row, batch)
    tb = max(8, (tb // 8) * 8)
    if batch >= 16:
        tb = min(tb, max(8, ((batch // 2) // 8) * 8))
    return tb


def dueling_q_forward(state, fused_params, action_size):
    (w1, b1, wh1, bh1, w2, b2) = fused_params
    batch, state_size = state.shape
    hidden = w1.shape[1]
    action_pad = w2.shape[1]

    state = state.astype(w1.dtype)   # bf16 on the MXU path

    # Resident weight bytes (double-buffer worst case, for budgeting headroom).
    resident = 2 * sum(_nbytes(x) for x in (w1, b1, wh1, bh1, w2, b2))
    tb = _pick_batch_tile(batch, state_size, action_pad, resident)
    grid = (pl.cdiv(batch, tb),)     # trailing partial block is masked by Pallas

    vmem_limit = int(min(
        _VMEM_SOFT_CAP,
        max(16 * 1024 * 1024,
            resident
            + 2 * tb * (state_size * state.dtype.itemsize + action_pad * 4)
            + 4 * 1024 * 1024)))

    batch_map = lambda i: (i, 0)
    const_map = lambda i: (0, 0)

    flops = 2 * batch * (state_size * hidden
                         + hidden * (2 * hidden)
                         + (2 * hidden) * action_pad)
    bytes_accessed = int(sum(_nbytes(x) for x in (w1, b1, wh1, bh1, w2, b2))
                         + _nbytes(state) + batch * action_pad * 4)

    def run(single_buffer_weights):
        # Grid-invariant operands never need re-fetching: single-buffer them to
        # halve weight VMEM residency (falls back to default if unsupported).
        const_kwargs = ({"pipeline_mode": pl.Buffered(1)}
                        if single_buffer_weights else {})
        in_specs = [
            pl.BlockSpec((tb, state_size), batch_map),                          # state tile
            pl.BlockSpec((state_size, hidden), const_map, **const_kwargs),      # w1
            pl.BlockSpec((1, hidden), const_map, **const_kwargs),               # b1
            pl.BlockSpec((hidden, 2 * hidden), const_map, **const_kwargs),      # fused head L1 W
            pl.BlockSpec((1, 2 * hidden), const_map, **const_kwargs),           # fused head L1 b
            pl.BlockSpec((2 * hidden, action_pad), const_map, **const_kwargs),  # fused head L2 W
            pl.BlockSpec((1, action_pad), const_map, **const_kwargs),           # fused head L2 b
        ]
        return pl.pallas_call(
            dueling_q_kernel,
            out_shape=jax.ShapeDtypeStruct((batch, action_pad), jnp.float32),
            grid=grid,
            in_specs=in_specs,
            out_specs=pl.BlockSpec((tb, action_pad), batch_map),
            compiler_params=pltpu.CompilerParams(
                dimension_semantics=("parallel",),
                vmem_limit_bytes=vmem_limit),
            cost_estimate=pl.CostEstimate(flops=flops, transcendentals=0,
                                          bytes_accessed=bytes_accessed),
        )(state, w1, b1, wh1, bh1, w2, b2)

    try:
        q_pad = run(True)
    except Exception:
        q_pad = run(False)   # Buffered(1) unsupported on this jax: default buffering

    return q_pad[:, :action_size]


def init_params(key, state_size, action_size, hidden_size):
    # Deterministic synthetic parameters (PyTorch-style uniform fan-in init),
    # stored as [in, out] matrices and [1, out] bias rows, f32.
    keys = jax.random.split(key, 10)

    def lin(kw, kb, fan_in, fan_out):
        bound = 1.0 / jnp.sqrt(fan_in)
        w = jax.random.uniform(kw, (fan_in, fan_out), jnp.float32, -bound, bound)
        b = jax.random.uniform(kb, (1, fan_out), jnp.float32, -bound, bound)
        return w, b

    w1, b1 = lin(keys[0], keys[1], state_size, hidden_size)
    wv1, bv1 = lin(keys[2], keys[3], hidden_size, hidden_size)
    wv2, bv2 = lin(keys[4], keys[5], hidden_size, 1)
    wa1, ba1 = lin(keys[6], keys[7], hidden_size, hidden_size)
    wa2, ba2 = lin(keys[8], keys[9], hidden_size, action_size)
    return (w1, b1, wv1, bv1, wv2, bv2, wa1, ba1, wa2, ba2)


def reference_forward(state, params):
    # Pure-JAX f32 reference mirroring the PyTorch module (unfused parameters).
    (w1, b1, wv1, bv1, wv2, bv2, wa1, ba1, wa2, ba2) = params
    feat = jnp.maximum(state @ w1 + b1, 0.0)
    v = jnp.maximum(feat @ wv1 + bv1, 0.0) @ wv2 + bv2
    a = jnp.maximum(feat @ wa1 + ba1, 0.0) @ wa2 + ba2
    return v + a - a.mean(axis=-1, keepdims=True)


if __name__ == "__main__":
    batch = 8
    state_size = 32
    action_size = 8
    hidden_size = 32

    key = jax.random.PRNGKey(0)
    k_state, k_params = jax.random.split(key)
    state = jax.random.normal(k_state, (batch, state_size), jnp.float32)
    params = init_params(k_params, state_size, action_size, hidden_size)
    fused = fuse_params(params)

    q = dueling_q_forward(state, fused, action_size)
    jax.block_until_ready(q)

    q_ref = reference_forward(state, params)
    assert q.shape == (batch, action_size)
    # bf16 matmuls with f32 accumulation vs. the pure-f32 reference.
    assert jnp.allclose(q, q_ref, atol=5e-2, rtol=5e-2)

    print("KERNEL_OK")
</pallas_src>

<mosaic_0001>
module attributes {stable_mosaic.version = 11 : i64} {
  func.func @dueling_q_kernel(%arg0: i32, %arg1: memref<8x32xbf16, #tpu.memory_space<vmem>>, %arg2: memref<32x32xbf16, #tpu.memory_space<vmem>>, %arg3: memref<1x32xf32, #tpu.memory_space<vmem>>, %arg4: memref<32x64xbf16, #tpu.memory_space<vmem>>, %arg5: memref<1x64xf32, #tpu.memory_space<vmem>>, %arg6: memref<64x128xbf16, #tpu.memory_space<vmem>>, %arg7: memref<1x128xf32, #tpu.memory_space<vmem>>, %arg8: memref<8x128xf32, #tpu.memory_space<vmem>>) attributes {dimension_semantics = [#tpu.dimension_semantics<parallel>], iteration_bounds = array<i64: 1>, scalar_prefetch = 0 : i64, scratch_operands = 0 : i64, tpu.core_type = #tpu.core_type<tc>, window_params = [{transform_indices = @transform_0, window_bounds = array<i64: 8, 32>}, {pipeline_mode = #tpu.pipeline_mode<synchronous>, transform_indices = @transform_1, window_bounds = array<i64: 32, 32>}, {pipeline_mode = #tpu.pipeline_mode<synchronous>, transform_indices = @transform_2, window_bounds = array<i64: 1, 32>}, {pipeline_mode = #tpu.pipeline_mode<synchronous>, transform_indices = @transform_3, window_bounds = array<i64: 32, 64>}, {pipeline_mode = #tpu.pipeline_mode<synchronous>, transform_indices = @transform_4, window_bounds = array<i64: 1, 64>}, {pipeline_mode = #tpu.pipeline_mode<synchronous>, transform_indices = @transform_5, window_bounds = array<i64: 64, 128>}, {pipeline_mode = #tpu.pipeline_mode<synchronous>, transform_indices = @transform_6, window_bounds = array<i64: 1, 128>}, {transform_indices = @transform_7, window_bounds = array<i64: 8, 128>}]} {
    %c0 = arith.constant 0 : index
    %c0_0 = arith.constant 0 : index
    %0 = vector.load %arg1[%c0, %c0_0] : memref<8x32xbf16, #tpu.memory_space<vmem>>, vector<8x32xbf16>
    %c0_1 = arith.constant 0 : index
    %c0_2 = arith.constant 0 : index
    %1 = vector.load %arg2[%c0_1, %c0_2] : memref<32x32xbf16, #tpu.memory_space<vmem>>, vector<32x32xbf16>
    %cst = arith.constant dense<0.000000e+00> : vector<8x32xf32>
    %2 = tpu.matmul %0, %1, %cst {dimension_numbers = #tpu.dot_dimension_numbers<[1], [0], [0], [1], [0, 0, 1, 1], [], []>} : vector<8x32xbf16>, vector<32x32xbf16>, vector<8x32xf32> -> vector<8x32xf32>
    %c0_3 = arith.constant 0 : index
    %c0_4 = arith.constant 0 : index
    %3 = vector.load %arg3[%c0_3, %c0_4] : memref<1x32xf32, #tpu.memory_space<vmem>>, vector<1x32xf32>
    %4 = vector.broadcast %3 : vector<1x32xf32> to vector<8x32xf32>
    %5 = arith.addf %2, %4 : vector<8x32xf32>
    %cst_5 = arith.constant 0.000000e+00 : f32
    %6 = vector.broadcast %cst_5 : f32 to vector<8x32xf32>
    %7 = arith.maximumf %5, %6 : vector<8x32xf32>
    %8 = arith.truncf %7 : vector<8x32xf32> to vector<8x32xbf16>
    %c0_6 = arith.constant 0 : index
    %c0_7 = arith.constant 0 : index
    %9 = vector.load %arg4[%c0_6, %c0_7] : memref<32x64xbf16, #tpu.memory_space<vmem>>, vector<32x64xbf16>
    %cst_8 = arith.constant dense<0.000000e+00> : vector<8x64xf32>
    %10 = tpu.matmul %8, %9, %cst_8 {dimension_numbers = #tpu.dot_dimension_numbers<[1], [0], [0], [1], [0, 0, 1, 1], [], []>} : vector<8x32xbf16>, vector<32x64xbf16>, vector<8x64xf32> -> vector<8x64xf32>
    %c0_9 = arith.constant 0 : index
    %c0_10 = arith.constant 0 : index
    %11 = vector.load %arg5[%c0_9, %c0_10] : memref<1x64xf32, #tpu.memory_space<vmem>>, vector<1x64xf32>
    %12 = vector.broadcast %11 : vector<1x64xf32> to vector<8x64xf32>
    %13 = arith.addf %10, %12 : vector<8x64xf32>
    %cst_11 = arith.constant 0.000000e+00 : f32
    %14 = vector.broadcast %cst_11 : f32 to vector<8x64xf32>
    %15 = arith.maximumf %13, %14 : vector<8x64xf32>
    %16 = arith.truncf %15 : vector<8x64xf32> to vector<8x64xbf16>
    %c0_12 = arith.constant 0 : index
    %c0_13 = arith.constant 0 : index
    %17 = vector.load %arg6[%c0_12, %c0_13] : memref<64x128xbf16, #tpu.memory_space<vmem>>, vector<64x128xbf16>
    %cst_14 = arith.constant dense<0.000000e+00> : vector<8x128xf32>
    %18 = tpu.matmul %16, %17, %cst_14 {dimension_numbers = #tpu.dot_dimension_numbers<[1], [0], [0], [1], [0, 0, 1, 1], [], []>} : vector<8x64xbf16>, vector<64x128xbf16>, vector<8x128xf32> -> vector<8x128xf32>
    %c0_15 = arith.constant 0 : index
    %c0_16 = arith.constant 0 : index
    %19 = vector.load %arg7[%c0_15, %c0_16] : memref<1x128xf32, #tpu.memory_space<vmem>>, vector<1x128xf32>
    %20 = vector.broadcast %19 : vector<1x128xf32> to vector<8x128xf32>
    %21 = arith.addf %18, %20 : vector<8x128xf32>
    %c0_17 = arith.constant 0 : index
    %c0_18 = arith.constant 0 : index
    %22 = vector.load %arg8[%c0_17, %c0_18] : memref<8x128xf32, #tpu.memory_space<vmem>>, vector<8x128xf32>
    tpu.vector_store %arg8[%c0_17, %c0_18], %21 {strides = array<i32>} : memref<8x128xf32, #tpu.memory_space<vmem>>, vector<8x128xf32>,
    return
  }
  func.func @transform_0(%arg0: i32) -> (i32, i32) {
    %c0_i32 = arith.constant 0 : i32
    %c0_i32_0 = arith.constant 0 : i32
    return %arg0, %c0_i32 : i32, i32
  }
  func.func @transform_1(%arg0: i32) -> (i32, i32) {
    %c0_i32 = arith.constant 0 : i32
    %c0_i32_0 = arith.constant 0 : i32
    %c0_i32_1 = arith.constant 0 : i32
    return %c0_i32, %c0_i32_0 : i32, i32
  }
  func.func @transform_2(%arg0: i32) -> (i32, i32) {
    %c0_i32 = arith.constant 0 : i32
    %c0_i32_0 = arith.constant 0 : i32
    %c0_i32_1 = arith.constant 0 : i32
    return %c0_i32, %c0_i32_0 : i32, i32
  }
  func.func @transform_3(%arg0: i32) -> (i32, i32) {
    %c0_i32 = arith.constant 0 : i32
    %c0_i32_0 = arith.constant 0 : i32
    %c0_i32_1 = arith.constant 0 : i32
    return %c0_i32, %c0_i32_0 : i32, i32
  }
  func.func @transform_4(%arg0: i32) -> (i32, i32) {
    %c0_i32 = arith.constant 0 : i32
    %c0_i32_0 = arith.constant 0 : i32
    %c0_i32_1 = arith.constant 0 : i32
    return %c0_i32, %c0_i32_0 : i32, i32
  }
  func.func @transform_5(%arg0: i32) -> (i32, i32) {
    %c0_i32 = arith.constant 0 : i32
    %c0_i32_0 = arith.constant 0 : i32
    %c0_i32_1 = arith.constant 0 : i32
    return %c0_i32, %c0_i32_0 : i32, i32
  }
  func.func @transform_6(%arg0: i32) -> (i32, i32) {
    %c0_i32 = arith.constant 0 : i32
    %c0_i32_0 = arith.constant 0 : i32
    %c0_i32_1 = arith.constant 0 : i32
    return %c0_i32, %c0_i32_0 : i32, i32
  }
  func.func @transform_7(%arg0: i32) -> (i32, i32) {
    %c0_i32 = arith.constant 0 : i32
    %c0_i32_0 = arith.constant 0 : i32
    return %arg0, %c0_i32 : i32, i32
  }
}

module attributes {stable_mosaic.version = 11 : i64} {
  func.func @dueling_q_kernel(%arg0: i32, %arg1: memref<8x32xbf16, #tpu.memory_space<vmem>>, %arg2: memref<32x32xbf16, #tpu.memory_space<vmem>>, %arg3: memref<1x32xf32, #tpu.memory_space<vmem>>, %arg4: memref<32x64xbf16, #tpu.memory_space<vmem>>, %arg5: memref<1x64xf32, #tpu.memory_space<vmem>>, %arg6: memref<64x128xbf16, #tpu.memory_space<vmem>>, %arg7: memref<1x128xf32, #tpu.memory_space<vmem>>, %arg8: memref<8x128xf32, #tpu.memory_space<vmem>>) attributes {dimension_semantics = [#tpu.dimension_semantics<parallel>], iteration_bounds = array<i64: 1>, scalar_prefetch = 0 : i64, scratch_operands = 0 : i64, tpu.core_type = #tpu.core_type<tc>, window_params = [{transform_indices = @transform_0, window_bounds = array<i64: 8, 32>}, {pipeline_mode = #tpu.pipeline_mode<synchronous>, transform_indices = @transform_1, window_bounds = array<i64: 32, 32>}, {pipeline_mode = #tpu.pipeline_mode<synchronous>, transform_indices = @transform_2, window_bounds = array<i64: 1, 32>}, {pipeline_mode = #tpu.pipeline_mode<synchronous>, transform_indices = @transform_3, window_bounds = array<i64: 32, 64>}, {pipeline_mode = #tpu.pipeline_mode<synchronous>, transform_indices = @transform_4, window_bounds = array<i64: 1, 64>}, {pipeline_mode = #tpu.pipeline_mode<synchronous>, transform_indices = @transform_5, window_bounds = array<i64: 64, 128>}, {pipeline_mode = #tpu.pipeline_mode<synchronous>, transform_indices = @transform_6, window_bounds = array<i64: 1, 128>}, {transform_indices = @transform_7, window_bounds = array<i64: 8, 128>}]} {
    %c0 = arith.constant 0 : index
    %c0_0 = arith.constant 0 : index
    %0 = vector.load %arg1[%c0, %c0_0] : memref<8x32xbf16, #tpu.memory_space<vmem>>, vector<8x32xbf16>
    %c0_1 = arith.constant 0 : index
    %c0_2 = arith.constant 0 : index
    %1 = vector.load %arg2[%c0_1, %c0_2] : memref<32x32xbf16, #tpu.memory_space<vmem>>, vector<32x32xbf16>
    %cst = arith.constant dense<0.000000e+00> : vector<8x32xf32>
    %2 = tpu.matmul %0, %1, %cst {dimension_numbers = #tpu.dot_dimension_numbers<[1], [0], [0], [1], [0, 0, 1, 1], [], []>} : vector<8x32xbf16>, vector<32x32xbf16>, vector<8x32xf32> -> vector<8x32xf32>
    %c0_3 = arith.constant 0 : index
    %c0_4 = arith.constant 0 : index
    %3 = vector.load %arg3[%c0_3, %c0_4] : memref<1x32xf32, #tpu.memory_space<vmem>>, vector<1x32xf32>
    %4 = vector.broadcast %3 : vector<1x32xf32> to vector<8x32xf32>
    %5 = arith.addf %2, %4 : vector<8x32xf32>
    %cst_5 = arith.constant 0.000000e+00 : f32
    %6 = vector.broadcast %cst_5 : f32 to vector<8x32xf32>
    %7 = arith.maximumf %5, %6 : vector<8x32xf32>
    %8 = arith.truncf %7 : vector<8x32xf32> to vector<8x32xbf16>
    %c0_6 = arith.constant 0 : index
    %c0_7 = arith.constant 0 : index
    %9 = vector.load %arg4[%c0_6, %c0_7] : memref<32x64xbf16, #tpu.memory_space<vmem>>, vector<32x64xbf16>
    %cst_8 = arith.constant dense<0.000000e+00> : vector<8x64xf32>
    %10 = tpu.matmul %8, %9, %cst_8 {dimension_numbers = #tpu.dot_dimension_numbers<[1], [0], [0], [1], [0, 0, 1, 1], [], []>} : vector<8x32xbf16>, vector<32x64xbf16>, vector<8x64xf32> -> vector<8x64xf32>
    %c0_9 = arith.constant 0 : index
    %c0_10 = arith.constant 0 : index
    %11 = vector.load %arg5[%c0_9, %c0_10] : memref<1x64xf32, #tpu.memory_space<vmem>>, vector<1x64xf32>
    %12 = vector.broadcast %11 : vector<1x64xf32> to vector<8x64xf32>
    %13 = arith.addf %10, %12 : vector<8x64xf32>
    %cst_11 = arith.constant 0.000000e+00 : f32
    %14 = vector.broadcast %cst_11 : f32 to vector<8x64xf32>
    %15 = arith.maximumf %13, %14 : vector<8x64xf32>
    %16 = arith.truncf %15 : vector<8x64xf32> to vector<8x64xbf16>
    %c0_12 = arith.constant 0 : index
    %c0_13 = arith.constant 0 : index
    %17 = vector.load %arg6[%c0_12, %c0_13] : memref<64x128xbf16, #tpu.memory_space<vmem>>, vector<64x128xbf16>
    %cst_14 = arith.constant dense<0.000000e+00> : vector<8x128xf32>
    %18 = tpu.matmul %16, %17, %cst_14 {dimension_numbers = #tpu.dot_dimension_numbers<[1], [0], [0], [1], [0, 0, 1, 1], [], []>} : vector<8x64xbf16>, vector<64x128xbf16>, vector<8x128xf32> -> vector<8x128xf32>
    %c0_15 = arith.constant 0 : index
    %c0_16 = arith.constant 0 : index
    %19 = vector.load %arg7[%c0_15, %c0_16] : memref<1x128xf32, #tpu.memory_space<vmem>>, vector<1x128xf32>
    %20 = vector.broadcast %19 : vector<1x128xf32> to vector<8x128xf32>
    %21 = arith.addf %18, %20 : vector<8x128xf32>
    %c0_17 = arith.constant 0 : index
    %c0_18 = arith.constant 0 : index
    %22 = vector.load %arg8[%c0_17, %c0_18] : memref<8x128xf32, #tpu.memory_space<vmem>>, vector<8x128xf32>
    tpu.vector_store %arg8[%c0_17, %c0_18], %21 {strides = array<i32>} : memref<8x128xf32, #tpu.memory_space<vmem>>, vector<8x128xf32>,
    return
  }
  func.func @transform_0(%arg0: i32) -> (i32, i32) {
    %c0_i32 = arith.constant 0 : i32
    %c0_i32_0 = arith.constant 0 : i32
    return %arg0, %c0_i32 : i32, i32
  }
  func.func @transform_1(%arg0: i32) -> (i32, i32) {
    %c0_i32 = arith.constant 0 : i32
    %c0_i32_0 = arith.constant 0 : i32
    %c0_i32_1 = arith.constant 0 : i32
    return %c0_i32, %c0_i32_0 : i32, i32
  }
  func.func @transform_2(%arg0: i32) -> (i32, i32) {
    %c0_i32 = arith.constant 0 : i32
    %c0_i32_0 = arith.constant 0 : i32
    %c0_i32_1 = arith.constant 0 : i32
    return %c0_i32, %c0_i32_0 : i32, i32
  }
  func.func @transform_3(%arg0: i32) -> (i32, i32) {
    %c0_i32 = arith.constant 0 : i32
    %c0_i32_0 = arith.constant 0 : i32
    %c0_i32_1 = arith.constant 0 : i32
    return %c0_i32, %c0_i32_0 : i32, i32
  }
  func.func @transform_4(%arg0: i32) -> (i32, i32) {
    %c0_i32 = arith.constant 0 : i32
    %c0_i32_0 = arith.constant 0 : i32
    %c0_i32_1 = arith.constant 0 : i32
    return %c0_i32, %c0_i32_0 : i32, i32
  }
  func.func @transform_5(%arg0: i32) -> (i32, i32) {
    %c0_i32 = arith.constant 0 : i32
    %c0_i32_0 = arith.constant 0 : i32
    %c0_i32_1 = arith.constant 0 : i32
    return %c0_i32, %c0_i32_0 : i32, i32
  }
  func.func @transform_6(%arg0: i32) -> (i32, i32) {
    %c0_i32 = arith.constant 0 : i32
    %c0_i32_0 = arith.constant 0 : i32
    %c0_i32_1 = arith.constant 0 : i32
    return %c0_i32, %c0_i32_0 : i32, i32
  }
  func.func @transform_7(%arg0: i32) -> (i32, i32) {
    %c0_i32 = arith.constant 0 : i32
    %c0_i32_0 = arith.constant 0 : i32
    return %arg0, %c0_i32 : i32, i32
  }
}

</mosaic_0001>

<bundles_post_ra>
// kernel: tpu_custom_call.1
= control target key start
LH: loop header
LB: loop body
LE: loop exit
PB: predicated region body
PF: predicated region fallthrough
CT: control target
= control target key end

     0   :  { %12 = vsyncpa [#allocation3], 0  ;;  %s492_s0 = inlined_call_operand.hbm [shape: bf16[8,32], index: 0, kind: input, shape index: {}]   ;;  %s493_s1 = inlined_call_operand.hbm [shape: bf16[32,32], index: 1, kind: input, shape index: {}]   ;;  %s494_s2 = inlined_call_operand.vmem [shape: f32[1,32], index: 2, kind: input, shape index: {}]   ;;  %s495_s3 = inlined_call_operand.hbm [shape: bf16[32,64], index: 3, kind: input, shape index: {}]   ;;  %s496_s4 = inlined_call_operand.vmem [shape: f32[1,64], index: 4, kind: input, shape index: {}]   ;;  %s497_s5 = inlined_call_operand.hbm [shape: bf16[64,128], index: 5, kind: input, shape index: {}]   ;;  %s498_s6 = inlined_call_operand.vmem [shape: f32[1,128], index: 6, kind: input, shape index: {}]   ;;  %s499_s7 = inlined_call_operand.hbm [shape: f32[8,128], index: 7, kind: output, shape index: {}]  }
   0x1   :  { %13 = vsyncpa [#allocation6], 0 }
   0x2   :  { %14 = vsyncpa [#allocation9], 0  ;;  %s31_s26 = sshll.u32 %s493_s1, 4  ;;  %s32_s26 = int_to_ptr.hbm [resolvable:$true] %s31_s26 }
   0x3   :  { %15 = vsyncpa [#allocation4], 0  ;;  %s421_s27 = smov [#allocation5]   ;;  %s21_s8 = sshll.u32 %s492_s0, 4  ;;  %s22_s8 = int_to_ptr.hbm [resolvable:$true] %s21_s8 }
   0x4   :  { %s33_s28 = sshll.u32 %s421_s27, 4  ;;  %s422_s9 = smov 64   ;;  %s34_s28 = int_to_ptr.vmem [resolvable:$true] %s33_s28 }
   0x5   :  { %s423_s10 = smov 4   ;;  %s424_s11 = smov [#allocation2]  }
   0x6   :  { %39 = dma.hbm_to_vmem [thread:$0]  %s32_s26, 256, %s34_s28, [#allocation6], %s422_s9, %s422_s9, %s423_s10  }
   0x7   :  { %s23_s12 = sshll.u32 %s424_s11, 4  ;;  %s46_s15 = sshll.u32 %s495_s3, 4  ;;  %s24_s12 = int_to_ptr.vmem [resolvable:$true] %s23_s12  ;;  %s47_s15 = int_to_ptr.hbm [resolvable:$true] %s46_s15 }
   0x8   :  { %26 = dma.hbm_to_vmem [thread:$0]  %s22_s8, 64, %s24_s12, [#allocation3]  }
   0x9   :  { %s61_s17 = sshll.u32 %s497_s5, 4  ;;  %s425_s18 = smov [#allocation7]   ;;  %s62_s17 = int_to_ptr.hbm [resolvable:$true] %s61_s17 }
   0xa   :  { %s48_s19 = sshll.u32 %s425_s18, 4  ;;  %s426_s0 = smov [#allocation8]   ;;  %s49_s19 = int_to_ptr.vmem [resolvable:$true] %s48_s19 }
   0xb   :  { %54 = dma.hbm_to_vmem [thread:$0]  %s47_s15, 256, %s49_s19, [#allocation6], %s422_s9, %s422_s9, %s423_s10  }
   0xc   :  { %s63_s20 = sshll.u32 %s426_s0, 4  ;;  %s64_s20 = int_to_ptr.vmem [resolvable:$true] %s63_s20 }
   0xd   :  { %69 = dma.hbm_to_vmem [thread:$0]  %s62_s17, 512, %s64_s20, [#allocation9], %s422_s9, %s422_s9, %s423_s10  }
   0xe   :  { %413 = dma.done.wait [#allocation3], 64  }
   0xf   :  { %414 = vsyncadd [#allocation3], 4294967232 }
  0x10   :  { %415 = dma.done.wait [#allocation6], 512  }
  0x11   :  { %416 = vsyncadd [#allocation6], 4294966784 }
  0x12   :  { %417 = dma.done.wait [#allocation9], 512  }
  0x13   :  { %418 = vsyncadd [#allocation9], 4294966784  ;;  %v276_v0 = vld [vmem:[#allocation5 + $0x8] sm:$0xff]  ;;  %v275_v1 = vld [vmem:[#allocation5] sm:$0xff]  ;;  %vm110_vm0 = vcmask 261120   ;;  %vm203_vm1 = vcmask 523264  }
  0x14   :  { %120 = vmatpush.bf16.msra.mxu0 %v276_v0  ;;  %v89_v2 = vld [vmem:[#allocation2] sm:$0xf]  ;;  %v277_v4 = vld [vmem:[#allocation7] sm:$0xff]  ;;  %v280_v13 = vld [vmem:[#allocation8 + $0x8] sm:$0xff]  ;;  %s427_s24 = smov [#allocation10]   ;;  %s228_s28 = sshll.u32 %s499_s7, 4  ;;  %s229_s28 = int_to_ptr.hbm [resolvable:$true] %s228_s28 }
  0x15   :  { %v278_v3 = vld [vmem:[#allocation7 + $0x8] sm:$0xff]  ;;  %v281_v6 = vld [vmem:[#allocation8 + $0x10] sm:$0xff]  ;;  %v279_v14 = vld [vmem:[#allocation8] sm:$0xff]  ;;  %s226_s25 = sshll.u32 %s427_s24, 4  ;;  %s227_s25 = int_to_ptr.vmem [resolvable:$true] %s226_s25 }
  0x16   :  { %158 = vmatpush.bf16.msra.mxu1 %v278_v3  ;;  %v282_v5 = vld [vmem:[#allocation8 + $0x18] sm:$0xff] }
  0x17   :  { %211 = vmatpush.bf16.msra.mxu2 %v282_v5  ;;  %v290_v7 = vld [vmem:[%s494_s2] ss:$0 sm:$0xff] }
  0x18   :  { %121 = vmatpush.bf16.msra.mxu0 %v275_v1  ;;  %v291_v15 = vld [vmem:[%s496_s4] ss:$0 sm:$0xff] }
  0x19   :  { %v292_v21 = vld [vmem:[%s498_s6] ss:$0 sm:$0xff] }
  0x1a   :  { %159 = vmatpush.bf16.msra.mxu1 %v277_v4 }
  0x1b   :  { %248 = vmatmul.msk.bf16.vlgmr.msra.gmra.mxu0 %vm110_vm0, %v89_v2  ;;  %212 = vmatpush.bf16.msra.mxu2 %v281_v6 }
  0x1f   :  { %213 = vmatpush.bf16.msra.mxu2 %v280_v13 }
  0x23   :  { %214 = vmatpush.bf16.msra.mxu2 %v279_v14 }
  0x98   :  { %v123_v8 = vpop.f32.mrf.mxu0 }
  0x99   :  { %v124_v9 = vadd.f32 %v290_v7, %v123_v8 }
  0x9b   :  { %v127_v10 = vmax.f32 %v124_v9, 0.0 }
  0x9d   :  { %v128_v11 = vpack.c.bf16 %v127_v10, %v127_v10 }
  0x9f   :  { %257 = vmatmul.msk.bf16.vlgmr.msra.gmra.mxu1 %vm110_vm0, %v128_v11 }
  0xa0   :  { %v125_v12 = vpop.f32.mrf.mxu0 }
 0x11c   :  { %v161_v16 = vpop.f32.mrf.mxu1 }
 0x11d   :  { %v162_v17 = vadd.f32 %v291_v15, %v161_v16 }
 0x11f   :  { %v165_v18 = vmax.f32 %v162_v17, 0.0 }
 0x121   :  { %v166_v19 = vpack.c.bf16 %v165_v18, %v165_v18 }
 0x123   :  { %274 = vmatmul.msk.bf16.vlgmr.msra.gmra.mxu2 %vm203_vm1, %v166_v19 }
 0x124   :  { %v163_v20 = vpop.f32.mrf.mxu1 }
 0x1a6   :  { %v216_v22 = vpop.f32.mrf.mxu2 }
 0x1a7   :  { %v217_v23 = vadd.f32 %v292_v21, %v216_v22 }
 0x1a9   :  { %220 = vst [vmem:[#allocation10] sm:$0xff] %v217_v23 }
 0x1aa   :  { %231 = dma.vmem_to_hbm [thread:$0]  %s227_s25, 128, %s229_s28, [#allocation4]  }
 0x1ae   :  { %v218_v24 = vpop.f32.mrf.mxu2 }
 0x1af   :  { %419 = dma.done.wait [#allocation4], 128  }
 0x1b0   :  { %420 = vsyncadd [#allocation4], 4294967168 }
 0x1b1   :  { %236 = vsyncpa [#allocation3], 1 }
 0x1b2   :  { %237 = vsyncpa [#allocation6], 1 }
 0x1b3   :  { %238 = vsyncpa [#allocation9], 1 }
 0x1b4   :  { %239 = vsyncpa [#allocation4], 1 }

// kernel: tpu_custom_call.1
= control target key start
LH: loop header
LB: loop body
LE: loop exit
PB: predicated region body
PF: predicated region fallthrough
CT: control target
= control target key end

     0   :  { %12 = vsyncpa [#allocation3], 0  ;;  %s492_s0 = inlined_call_operand.hbm [shape: bf16[8,32], index: 0, kind: input, shape index: {}]   ;;  %s493_s1 = inlined_call_operand.hbm [shape: bf16[32,32], index: 1, kind: input, shape index: {}]   ;;  %s494_s2 = inlined_call_operand.vmem [shape: f32[1,32], index: 2, kind: input, shape index: {}]   ;;  %s495_s3 = inlined_call_operand.hbm [shape: bf16[32,64], index: 3, kind: input, shape index: {}]   ;;  %s496_s4 = inlined_call_operand.vmem [shape: f32[1,64], index: 4, kind: input, shape index: {}]   ;;  %s497_s5 = inlined_call_operand.hbm [shape: bf16[64,128], index: 5, kind: input, shape index: {}]   ;;  %s498_s6 = inlined_call_operand.vmem [shape: f32[1,128], index: 6, kind: input, shape index: {}]   ;;  %s499_s7 = inlined_call_operand.hbm [shape: f32[8,128], index: 7, kind: output, shape index: {}]  }
   0x1   :  { %13 = vsyncpa [#allocation6], 0 }
   0x2   :  { %14 = vsyncpa [#allocation9], 0  ;;  %s31_s26 = sshll.u32 %s493_s1, 4  ;;  %s32_s26 = int_to_ptr.hbm [resolvable:$true] %s31_s26 }
   0x3   :  { %15 = vsyncpa [#allocation4], 0  ;;  %s421_s27 = smov [#allocation5]   ;;  %s21_s8 = sshll.u32 %s492_s0, 4  ;;  %s22_s8 = int_to_ptr.hbm [resolvable:$true] %s21_s8 }
   0x4   :  { %s33_s28 = sshll.u32 %s421_s27, 4  ;;  %s422_s9 = smov 64   ;;  %s34_s28 = int_to_ptr.vmem [resolvable:$true] %s33_s28 }
   0x5   :  { %s423_s10 = smov 4   ;;  %s424_s11 = smov [#allocation2]  }
   0x6   :  { %39 = dma.hbm_to_vmem [thread:$0]  %s32_s26, 256, %s34_s28, [#allocation6], %s422_s9, %s422_s9, %s423_s10  }
   0x7   :  { %s23_s12 = sshll.u32 %s424_s11, 4  ;;  %s46_s15 = sshll.u32 %s495_s3, 4  ;;  %s24_s12 = int_to_ptr.vmem [resolvable:$true] %s23_s12  ;;  %s47_s15 = int_to_ptr.hbm [resolvable:$true] %s46_s15 }
   0x8   :  { %26 = dma.hbm_to_vmem [thread:$0]  %s22_s8, 64, %s24_s12, [#allocation3]  }
   0x9   :  { %s61_s17 = sshll.u32 %s497_s5, 4  ;;  %s425_s18 = smov [#allocation7]   ;;  %s62_s17 = int_to_ptr.hbm [resolvable:$true] %s61_s17 }
   0xa   :  { %s48_s19 = sshll.u32 %s425_s18, 4  ;;  %s426_s0 = smov [#allocation8]   ;;  %s49_s19 = int_to_ptr.vmem [resolvable:$true] %s48_s19 }
   0xb   :  { %54 = dma.hbm_to_vmem [thread:$0]  %s47_s15, 256, %s49_s19, [#allocation6], %s422_s9, %s422_s9, %s423_s10  }
   0xc   :  { %s63_s20 = sshll.u32 %s426_s0, 4  ;;  %s64_s20 = int_to_ptr.vmem [resolvable:$true] %s63_s20 }
   0xd   :  { %69 = dma.hbm_to_vmem [thread:$0]  %s62_s17, 512, %s64_s20, [#allocation9], %s422_s9, %s422_s9, %s423_s10  }
   0xe   :  { %413 = dma.done.wait [#allocation3], 64  }
   0xf   :  { %414 = vsyncadd [#allocation3], 4294967232 }
  0x10   :  { %415 = dma.done.wait [#allocation6], 512  }
  0x11   :  { %416 = vsyncadd [#allocation6], 4294966784 }
  0x12   :  { %417 = dma.done.wait [#allocation9], 512  }
  0x13   :  { %418 = vsyncadd [#allocation9], 4294966784  ;;  %v276_v0 = vld [vmem:[#allocation5 + $0x8] sm:$0xff]  ;;  %v275_v1 = vld [vmem:[#allocation5] sm:$0xff]  ;;  %vm110_vm0 = vcmask 261120   ;;  %vm203_vm1 = vcmask 523264  }
  0x14   :  { %120 = vmatpush.bf16.msra.mxu0 %v276_v0  ;;  %v89_v2 = vld [vmem:[#allocation2] sm:$0xf]  ;;  %v277_v4 = vld [vmem:[#allocation7] sm:$0xff]  ;;  %v280_v13 = vld [vmem:[#allocation8 + $0x8] sm:$0xff]  ;;  %s427_s24 = smov [#allocation10]   ;;  %s228_s28 = sshll.u32 %s499_s7, 4  ;;  %s229_s28 = int_to_ptr.hbm [resolvable:$true] %s228_s28 }
  0x15   :  { %v278_v3 = vld [vmem:[#allocation7 + $0x8] sm:$0xff]  ;;  %v281_v6 = vld [vmem:[#allocation8 + $0x10] sm:$0xff]  ;;  %v279_v14 = vld [vmem:[#allocation8] sm:$0xff]  ;;  %s226_s25 = sshll.u32 %s427_s24, 4  ;;  %s227_s25 = int_to_ptr.vmem [resolvable:$true] %s226_s25 }
  0x16   :  { %158 = vmatpush.bf16.msra.mxu1 %v278_v3  ;;  %v282_v5 = vld [vmem:[#allocation8 + $0x18] sm:$0xff] }
  0x17   :  { %211 = vmatpush.bf16.msra.mxu2 %v282_v5  ;;  %v290_v7 = vld [vmem:[%s494_s2] ss:$0 sm:$0xff] }
  0x18   :  { %121 = vmatpush.bf16.msra.mxu0 %v275_v1  ;;  %v291_v15 = vld [vmem:[%s496_s4] ss:$0 sm:$0xff] }
  0x19   :  { %v292_v21 = vld [vmem:[%s498_s6] ss:$0 sm:$0xff] }
  0x1a   :  { %159 = vmatpush.bf16.msra.mxu1 %v277_v4 }
  0x1b   :  { %248 = vmatmul.msk.bf16.vlgmr.msra.gmra.mxu0 %vm110_vm0, %v89_v2  ;;  %212 = vmatpush.bf16.msra.mxu2 %v281_v6 }
  0x1f   :  { %213 = vmatpush.bf16.msra.mxu2 %v280_v13 }
  0x23   :  { %214 = vmatpush.bf16.msra.mxu2 %v279_v14 }
  0x98   :  { %v123_v8 = vpop.f32.mrf.mxu0 }
  0x99   :  { %v124_v9 = vadd.f32 %v290_v7, %v123_v8 }
  0x9b   :  { %v127_v10 = vmax.f32 %v124_v9, 0.0 }
  0x9d   :  { %v128_v11 = vpack.c.bf16 %v127_v10, %v127_v10 }
  0x9f   :  { %257 = vmatmul.msk.bf16.vlgmr.msra.gmra.mxu1 %vm110_vm0, %v128_v11 }
  0xa0   :  { %v125_v12 = vpop.f32.mrf.mxu0 }
 0x11c   :  { %v161_v16 = vpop.f32.mrf.mxu1 }
 0x11d   :  { %v162_v17 = vadd.f32 %v291_v15, %v161_v16 }
 0x11f   :  { %v165_v18 = vmax.f32 %v162_v17, 0.0 }
 0x121   :  { %v166_v19 = vpack.c.bf16 %v165_v18, %v165_v18 }
 0x123   :  { %274 = vmatmul.msk.bf16.vlgmr.msra.gmra.mxu2 %vm203_vm1, %v166_v19 }
 0x124   :  { %v163_v20 = vpop.f32.mrf.mxu1 }
 0x1a6   :  { %v216_v22 = vpop.f32.mrf.mxu2 }
 0x1a7   :  { %v217_v23 = vadd.f32 %v292_v21, %v216_v22 }
 0x1a9   :  { %220 = vst [vmem:[#allocation10] sm:$0xff] %v217_v23 }
 0x1aa   :  { %231 = dma.vmem_to_hbm [thread:$0]  %s227_s25, 128, %s229_s28, [#allocation4]  }
 0x1ae   :  { %v218_v24 = vpop.f32.mrf.mxu2 }
 0x1af   :  { %419 = dma.done.wait [#allocation4], 128  }
 0x1b0   :  { %420 = vsyncadd [#allocation4], 4294967168 }
 0x1b1   :  { %236 = vsyncpa [#allocation3], 1 }
 0x1b2   :  { %237 = vsyncpa [#allocation6], 1 }
 0x1b3   :  { %238 = vsyncpa [#allocation9], 1 }
 0x1b4   :  { %239 = vsyncpa [#allocation4], 1 }

</bundles_post_ra>
